<compile_context>
chip_gen: v7x
topology: tpu7x:2x2x1
jax: 0.10.0
libtpu: 0.0.40
codegen_flags: <defaults>
</compile_context>

<pallas_src>
import functools

import jax
import jax.numpy as jnp
from jax.experimental import pallas as pl
from jax.experimental.pallas import tpu as pltpu

_SUBLANES = 8
_LANES = 128
_GROUP = _SUBLANES * _LANES  # 1024 elements per (8, 128) vreg group


def _ccc_moments_kernel(groups_ref, p_ref, g_ref, out_ref, *,
                        tile_groups, tiles_per_split, needs_mask):
    """Accumulates per-split raw moments into a resident (4, 8, 128) block."""
    i = pl.program_id(1)

    @pl.when(i == 0)
    def _init():
        out_ref[...] = jnp.zeros_like(out_ref)

    p = p_ref[...].astype(jnp.float32)
    g = g_ref[...].astype(jnp.float32)

    if needs_mask:
        # Mask (8,128)-groups that lie beyond the valid data: partial last
        # block and index-clamped fully-out-of-range blocks contribute zero.
        base = (pl.program_id(0) * tiles_per_split + i) * tile_groups
        gidx = jax.lax.broadcasted_iota(jnp.int32, p.shape, 0) + base
        valid = gidx < groups_ref[0]
        p = jnp.where(valid, p, 0.0)
        g = jnp.where(valid, g, 0.0)

    # Axis-0 reductions of (tile_groups, 8, 128) -> (8, 128): pure vreg adds
    # (no XLU); accumulators are four (8, 128) tiles of the resident output.
    out_ref[0] += jnp.sum(p, axis=0)
    out_ref[1] += jnp.sum(g, axis=0)
    out_ref[2] += jnp.sum(p * p + g * g, axis=0)   # s_pp and s_gg merged
    out_ref[3] += jnp.sum(p * g, axis=0)


def _reference_loss(prediction, ground_truth):
    """Pure-JAX replica of the PyTorch forward (also the tiny-N fast path)."""
    p = prediction.astype(jnp.float32)
    g = ground_truth.astype(jnp.float32)
    mean_g = jnp.mean(g)
    mean_p = jnp.mean(p)
    var_g = jnp.var(g, ddof=1)
    var_p = jnp.var(p, ddof=1)
    v_pred = p - mean_p
    v_gt = g - mean_g
    cor = jnp.sum(v_pred * v_gt) / (
        jnp.sqrt(jnp.sum(v_pred ** 2)) * jnp.sqrt(jnp.sum(v_gt ** 2))
    )
    sd_g = jnp.std(g, ddof=1)
    sd_p = jnp.std(p, ddof=1)
    numerator = 2 * cor * sd_g * sd_p
    denominator = var_g + var_p + (mean_g - mean_p) ** 2
    return 1.0 - numerator / denominator


def concordance_cc_loss(prediction, ground_truth, *, tile_groups=128,
                        n_splits=2, min_pallas_n=2048):
    """1 - CCC loss for 1-D prediction / ground_truth of shape (N,).

    tile_groups: (8,128)-groups per grid step (128 groups = 1024 rows = 512 KiB
      f32 per input block; 2 inputs x 2 buffers ~ 2 MiB VMEM, safe everywhere).
    n_splits: leading "parallel" grid axis; 2 lets both v7x TensorCores stream
      half the data (harmless on single-TC v5e/v6e).
    """
    assert prediction.shape == ground_truth.shape
    assert prediction.ndim == 1
    n = int(prediction.shape[0])

    # Tiny inputs: Pallas launch overhead dominates; plain XLA is faster.
    if n < min_pallas_n:
        return _reference_loss(prediction, ground_truth)

    groups = -(-n // _GROUP)                     # ceil(N / 1024)
    pad = groups * _GROUP - n
    if pad:
        # Zero padding contributes exactly 0 to every raw moment -> exact.
        # TODO(synk): this is the only remaining full-array copy (ragged N).
        p3 = jnp.pad(prediction, (0, pad)).reshape(groups, _SUBLANES, _LANES)
        g3 = jnp.pad(ground_truth, (0, pad)).reshape(groups, _SUBLANES, _LANES)
    else:
        p3 = prediction.reshape(groups, _SUBLANES, _LANES)   # metadata-only
        g3 = ground_truth.reshape(groups, _SUBLANES, _LANES)

    tile_groups = max(1, min(int(tile_groups), groups, 512))
    num_tiles = -(-groups // tile_groups)
    n_splits = max(1, min(int(n_splits), num_tiles))
    tiles_per_split = -(-num_tiles // n_splits)
    # Mask only needed if the (n_splits x tiles_per_split) grid over-covers.
    needs_mask = (n_splits * tiles_per_split * tile_groups != groups)

    def in_map(s, i, _groups_smem):
        b = s * tiles_per_split + i
        # Clamp over-shooting steps onto the last block; their contribution is
        # zeroed by the in-kernel group mask.
        return (jnp.minimum(b, num_tiles - 1), 0, 0)

    grid_spec = pltpu.PrefetchScalarGridSpec(
        num_scalar_prefetch=1,                   # [valid group count] in SMEM
        grid=(n_splits, tiles_per_split),
        in_specs=[
            pl.BlockSpec((tile_groups, _SUBLANES, _LANES), in_map),
            pl.BlockSpec((tile_groups, _SUBLANES, _LANES), in_map),
        ],
        out_specs=pl.BlockSpec((None, 4, _SUBLANES, _LANES),
                               lambda s, i, _g: (s, 0, 0, 0)),
    )

    parts = pl.pallas_call(
        functools.partial(_ccc_moments_kernel,
                          tile_groups=tile_groups,
                          tiles_per_split=tiles_per_split,
                          needs_mask=needs_mask),
        out_shape=jax.ShapeDtypeStruct((n_splits, 4, _SUBLANES, _LANES),
                                       jnp.float32),
        grid_spec=grid_spec,
        compiler_params=pltpu.CompilerParams(
            dimension_semantics=("parallel", "arbitrary")),
    )(jnp.array([groups], jnp.int32), p3, g3)

    # Tiny scalar epilogue in plain JAX (combines the per-split partials).
    sums = jnp.sum(parts, axis=(0, 2, 3))        # -> (4,)
    sum_p, sum_g, sum_sq, sum_pg = sums[0], sums[1], sums[2], sums[3]
    nf = float(n)
    mean_p = sum_p / nf
    mean_g = sum_g / nf
    s_sq = sum_sq - sum_p * mean_p - sum_g * mean_g      # s_pp + s_gg
    s_pg = sum_pg - sum_p * mean_g
    dmean = mean_g - mean_p
    # Note: denom == 0 (both inputs constant) yields NaN/Inf, matching the
    # PyTorch reference behavior.
    denom = s_sq + (nf - 1.0) * dmean * dmean
    ccc = 2.0 * s_pg / denom
    return (1.0 - ccc).astype(jnp.float32)


if __name__ == "__main__":
    # ConcordanceCorCoeff has no parameters; only synthetic inputs are needed.
    key = jax.random.PRNGKey(0)
    k1, k2, k3, k4 = jax.random.split(key, 4)

    # Ragged N (pads to 8 groups of 1024).
    N = 8000
    pred = jax.random.normal(k1, (N,), dtype=jnp.float32)
    gt = 0.7 * pred + 0.3 * jax.random.normal(k2, (N,), dtype=jnp.float32)

    loss_default = concordance_cc_loss(pred, gt)                  # single tile
    loss_tiled = concordance_cc_loss(pred, gt, tile_groups=3)     # partial + clamped blocks, 2 splits
    loss_bf16 = concordance_cc_loss(pred.astype(jnp.bfloat16),
                                    gt.astype(jnp.bfloat16))      # bf16 streaming path

    # Aligned N (zero-copy reshape), multi-tile, 2 splits, no mask.
    N2 = 8192
    pred2 = jax.random.normal(k3, (N2,), dtype=jnp.float32)
    gt2 = 0.5 * pred2 + 0.5 * jax.random.normal(k4, (N2,), dtype=jnp.float32)
    loss_aligned = concordance_cc_loss(pred2, gt2, tile_groups=2)

    jax.block_until_ready((loss_default, loss_tiled, loss_bf16, loss_aligned))

    ref = _reference_loss(pred, gt)
    ref_bf = _reference_loss(pred.astype(jnp.bfloat16), gt.astype(jnp.bfloat16))
    ref2 = _reference_loss(pred2, gt2)

    assert jnp.allclose(loss_default, ref, atol=1e-4, rtol=1e-4), (loss_default, ref)
    assert jnp.allclose(loss_tiled, ref, atol=1e-4, rtol=1e-4), (loss_tiled, ref)
    assert jnp.allclose(loss_bf16, ref_bf, atol=1e-3, rtol=1e-3), (loss_bf16, ref_bf)
    assert jnp.allclose(loss_aligned, ref2, atol=1e-4, rtol=1e-4), (loss_aligned, ref2)

    print("KERNEL_OK")
</pallas_src>

<mosaic_0001>
module attributes {stable_mosaic.version = 11 : i64} {
  func.func @_ccc_moments_kernel(%arg0: i32, %arg1: i32, %arg2: memref<1xi32, #tpu.memory_space<smem>>, %arg3: memref<8x8x128xf32, #tpu.memory_space<vmem>>, %arg4: memref<8x8x128xf32, #tpu.memory_space<vmem>>, %arg5: memref<1x4x8x128xf32, #tpu.memory_space<vmem>>) attributes {dimension_semantics = [#tpu.dimension_semantics<parallel>, #tpu.dimension_semantics<arbitrary>], iteration_bounds = array<i64: 1, 1>, scalar_prefetch = 1 : i64, scratch_operands = 0 : i64, tpu.core_type = #tpu.core_type<tc>, window_params = [{transform_indices = @transform_0, window_bounds = array<i64: 8, 8, 128>}, {transform_indices = @transform_1, window_bounds = array<i64: 8, 8, 128>}, {transform_indices = @transform_2, window_bounds = array<i64: 1, 4, 8, 128>}]} {
    %c0_i32 = arith.constant 0 : i32
    %0 = arith.cmpi eq, %arg1, %c0_i32 : i32
    %1 = arith.extui %0 : i1 to i32
    %c0_i32_0 = arith.constant 0 : i32
    %2 = arith.cmpi ne, %1, %c0_i32_0 : i32
    scf.if %2 {
      %cst_38 = arith.constant 0.000000e+00 : f32
      %37 = vector.broadcast %cst_38 : f32 to vector<4x8x128xf32>
      %c0_39 = arith.constant 0 : index
      %c0_40 = arith.constant 0 : index
      %c0_41 = arith.constant 0 : index
      %c0_42 = arith.constant 0 : index
      %38 = vector.load %arg5[%c0_39, %c0_40, %c0_41, %c0_42] : memref<1x4x8x128xf32, #tpu.memory_space<vmem>>, vector<1x4x8x128xf32>
      %39 = vector.shape_cast %38 : vector<1x4x8x128xf32> to vector<4x8x128xf32>
      %40 = vector.shape_cast %37 : vector<4x8x128xf32> to vector<1x4x8x128xf32>
      tpu.vector_store %arg5[%c0_39, %c0_40, %c0_41, %c0_42], %40 {strides = array<i32>} : memref<1x4x8x128xf32, #tpu.memory_space<vmem>>, vector<1x4x8x128xf32>,
    } else {
    }
    %c0 = arith.constant 0 : index
    %c0_1 = arith.constant 0 : index
    %c0_2 = arith.constant 0 : index
    %3 = vector.load %arg3[%c0, %c0_1, %c0_2] : memref<8x8x128xf32, #tpu.memory_space<vmem>>, vector<8x8x128xf32>
    %c0_3 = arith.constant 0 : index
    %c0_4 = arith.constant 0 : index
    %c0_5 = arith.constant 0 : index
    %4 = vector.load %arg4[%c0_3, %c0_4, %c0_5] : memref<8x8x128xf32, #tpu.memory_space<vmem>>, vector<8x8x128xf32>
    %c0_6 = arith.constant 0 : index
    %c0_7 = arith.constant 0 : index
    %c0_8 = arith.constant 0 : index
    %c0_9 = arith.constant 0 : index
    %5 = vector.load %arg5[%c0_6, %c0_7, %c0_8, %c0_9] : memref<1x4x8x128xf32, #tpu.memory_space<vmem>>, vector<1x1x8x128xf32>
    %6 = vector.shape_cast %5 : vector<1x1x8x128xf32> to vector<8x128xf32>
    %cst = arith.constant dense<0.000000e+00> : vector<8x128xf32>
    %7 = vector.multi_reduction <add>, %3, %cst [0] : vector<8x8x128xf32> to vector<8x128xf32>
    %8 = arith.addf %6, %7 : vector<8x128xf32>
    %c0_10 = arith.constant 0 : index
    %c0_11 = arith.constant 0 : index
    %c0_12 = arith.constant 0 : index
    %c0_13 = arith.constant 0 : index
    %9 = vector.load %arg5[%c0_10, %c0_11, %c0_12, %c0_13] : memref<1x4x8x128xf32, #tpu.memory_space<vmem>>, vector<1x1x8x128xf32>
    %10 = vector.shape_cast %9 : vector<1x1x8x128xf32> to vector<8x128xf32>
    %11 = vector.shape_cast %8 : vector<8x128xf32> to vector<1x1x8x128xf32>
    tpu.vector_store %arg5[%c0_10, %c0_11, %c0_12, %c0_13], %11 {strides = array<i32>} : memref<1x4x8x128xf32, #tpu.memory_space<vmem>>, vector<1x1x8x128xf32>,
    %c0_14 = arith.constant 0 : index
    %c1 = arith.constant 1 : index
    %c0_15 = arith.constant 0 : index
    %c0_16 = arith.constant 0 : index
    %12 = vector.load %arg5[%c0_14, %c1, %c0_15, %c0_16] : memref<1x4x8x128xf32, #tpu.memory_space<vmem>>, vector<1x1x8x128xf32>
    %13 = vector.shape_cast %12 : vector<1x1x8x128xf32> to vector<8x128xf32>
    %cst_17 = arith.constant dense<0.000000e+00> : vector<8x128xf32>
    %14 = vector.multi_reduction <add>, %4, %cst_17 [0] : vector<8x8x128xf32> to vector<8x128xf32>
    %15 = arith.addf %13, %14 : vector<8x128xf32>
    %c0_18 = arith.constant 0 : index
    %c1_19 = arith.constant 1 : index
    %c0_20 = arith.constant 0 : index
    %c0_21 = arith.constant 0 : index
    %16 = vector.load %arg5[%c0_18, %c1_19, %c0_20, %c0_21] : memref<1x4x8x128xf32, #tpu.memory_space<vmem>>, vector<1x1x8x128xf32>
    %17 = vector.shape_cast %16 : vector<1x1x8x128xf32> to vector<8x128xf32>
    %18 = vector.shape_cast %15 : vector<8x128xf32> to vector<1x1x8x128xf32>
    tpu.vector_store %arg5[%c0_18, %c1_19, %c0_20, %c0_21], %18 {strides = array<i32>} : memref<1x4x8x128xf32, #tpu.memory_space<vmem>>, vector<1x1x8x128xf32>,
    %c0_22 = arith.constant 0 : index
    %c2 = arith.constant 2 : index
    %c0_23 = arith.constant 0 : index
    %c0_24 = arith.constant 0 : index
    %19 = vector.load %arg5[%c0_22, %c2, %c0_23, %c0_24] : memref<1x4x8x128xf32, #tpu.memory_space<vmem>>, vector<1x1x8x128xf32>
    %20 = vector.shape_cast %19 : vector<1x1x8x128xf32> to vector<8x128xf32>
    %21 = arith.mulf %3, %3 : vector<8x8x128xf32>
    %22 = arith.mulf %4, %4 : vector<8x8x128xf32>
    %23 = arith.addf %21, %22 : vector<8x8x128xf32>
    %cst_25 = arith.constant dense<0.000000e+00> : vector<8x128xf32>
    %24 = vector.multi_reduction <add>, %23, %cst_25 [0] : vector<8x8x128xf32> to vector<8x128xf32>
    %25 = arith.addf %20, %24 : vector<8x128xf32>
    %c0_26 = arith.constant 0 : index
    %c2_27 = arith.constant 2 : index
    %c0_28 = arith.constant 0 : index
    %c0_29 = arith.constant 0 : index
    %26 = vector.load %arg5[%c0_26, %c2_27, %c0_28, %c0_29] : memref<1x4x8x128xf32, #tpu.memory_space<vmem>>, vector<1x1x8x128xf32>
    %27 = vector.shape_cast %26 : vector<1x1x8x128xf32> to vector<8x128xf32>
    %28 = vector.shape_cast %25 : vector<8x128xf32> to vector<1x1x8x128xf32>
    tpu.vector_store %arg5[%c0_26, %c2_27, %c0_28, %c0_29], %28 {strides = array<i32>} : memref<1x4x8x128xf32, #tpu.memory_space<vmem>>, vector<1x1x8x128xf32>,
    %c0_30 = arith.constant 0 : index
    %c3 = arith.constant 3 : index
    %c0_31 = arith.constant 0 : index
    %c0_32 = arith.constant 0 : index
    %29 = vector.load %arg5[%c0_30, %c3, %c0_31, %c0_32] : memref<1x4x8x128xf32, #tpu.memory_space<vmem>>, vector<1x1x8x128xf32>
    %30 = vector.shape_cast %29 : vector<1x1x8x128xf32> to vector<8x128xf32>
    %31 = arith.mulf %3, %4 : vector<8x8x128xf32>
    %cst_33 = arith.constant dense<0.000000e+00> : vector<8x128xf32>
    %32 = vector.multi_reduction <add>, %31, %cst_33 [0] : vector<8x8x128xf32> to vector<8x128xf32>
    %33 = arith.addf %30, %32 : vector<8x128xf32>
    %c0_34 = arith.constant 0 : index
    %c3_35 = arith.constant 3 : index
    %c0_36 = arith.constant 0 : index
    %c0_37 = arith.constant 0 : index
    %34 = vector.load %arg5[%c0_34, %c3_35, %c0_36, %c0_37] : memref<1x4x8x128xf32, #tpu.memory_space<vmem>>, vector<1x1x8x128xf32>
    %35 = vector.shape_cast %34 : vector<1x1x8x128xf32> to vector<8x128xf32>
    %36 = vector.shape_cast %33 : vector<8x128xf32> to vector<1x1x8x128xf32>
    tpu.vector_store %arg5[%c0_34, %c3_35, %c0_36, %c0_37], %36 {strides = array<i32>} : memref<1x4x8x128xf32, #tpu.memory_space<vmem>>, vector<1x1x8x128xf32>,
    return
  }
  func.func @transform_0(%arg0: i32, %arg1: i32, %arg2: memref<1xi32, #tpu.memory_space<smem>>) -> (i32, i32, i32) {
    %c1_i32 = arith.constant 1 : i32
    %0 = arith.muli %arg0, %c1_i32 : i32
    %1 = arith.addi %0, %arg1 : i32
    %c0_i32 = arith.constant 0 : i32
    %2 = arith.minsi %1, %c0_i32 : i32
    %c0_i32_0 = arith.constant 0 : i32
    %c0_i32_1 = arith.constant 0 : i32
    %c0_i32_2 = arith.constant 0 : i32
    return %2, %c0_i32_0, %c0_i32_1 : i32, i32, i32
  }
  func.func @transform_1(%arg0: i32, %arg1: i32, %arg2: memref<1xi32, #tpu.memory_space<smem>>) -> (i32, i32, i32) {
    %c1_i32 = arith.constant 1 : i32
    %0 = arith.muli %arg0, %c1_i32 : i32
    %1 = arith.addi %0, %arg1 : i32
    %c0_i32 = arith.constant 0 : i32
    %2 = arith.minsi %1, %c0_i32 : i32
    %c0_i32_0 = arith.constant 0 : i32
    %c0_i32_1 = arith.constant 0 : i32
    %c0_i32_2 = arith.constant 0 : i32
    return %2, %c0_i32_0, %c0_i32_1 : i32, i32, i32
  }
  func.func @transform_2(%arg0: i32, %arg1: i32, %arg2: memref<1xi32, #tpu.memory_space<smem>>) -> (i32, i32, i32, i32) {
    %c0_i32 = arith.constant 0 : i32
    %c0_i32_0 = arith.constant 0 : i32
    %c0_i32_1 = arith.constant 0 : i32
    %c0_i32_2 = arith.constant 0 : i32
    return %arg0, %c0_i32, %c0_i32_0, %c0_i32_1 : i32, i32, i32, i32
  }
}

</mosaic_0001>

<bundles_post_ra>
// kernel: tpu_custom_call.1
= control target key start
LH: loop header
LB: loop body
LE: loop exit
PB: predicated region body
PF: predicated region fallthrough
CT: control target
= control target key end

     0   :  { %9 = vsyncpa [#allocation5], 0  ;;  %s331_s0 = inlined_call_operand.<no memory space> [shape: s32[1], index: 0, kind: input, shape index: {}]   ;;  %s332_s1 = inlined_call_operand.hbm [shape: f32[8,8,128], index: 1, kind: input, shape index: {}]   ;;  %s333_s2 = inlined_call_operand.hbm [shape: f32[8,8,128], index: 2, kind: input, shape index: {}]   ;;  %s334_s3 = inlined_call_operand.hbm [shape: f32[1,4,8,128], index: 3, kind: output, shape index: {}]  }
   0x1   :  { %10 = vsyncpa [#allocation8], 0 }
   0x2   :  { %11 = vsyncpa [#allocation6], 0  ;;  %s261_s12 = smov [#allocation4]   ;;  %s189_s16 = scalar_lea.hbm %s332_s1, 1024 }
   0x3   :  { %s23_s13 = sshll.u32 %s261_s12, 4  ;;  %p190_p0 = scmp.ne.s32.totalorder %s332_s1, %s189_s16  ;;  %s24_s13 = int_to_ptr.vmem [resolvable:$true] %s23_s13 }
   0x4   :  { %p193_p1 = scmp.lt.u32.totalorder %s189_s16, %s332_s1 }
   0x6   :  { %p195_p2 = pnand %p193_p1, %p190_p0 }
   0x8   :  { %198 = shalt.err (!%p195_p2)
}
   0x9   :  { %s199_s20 = scalar_lea.vmem %s24_s13, 1024  ;;  %p204_p4 = scmp.lt.s32.totalorder %s24_s13, %s24_s13 }
   0xa   :  { %p200_p3 = scmp.ne.s32.totalorder %s24_s13, %s199_s20  ;;  %p205_p5 = scmp.lt.s32.totalorder %s199_s20, %s199_s20 }
   0xc   :  { %p206_p6 = por %p205_p5, %p204_p4 }
   0xe   :  { %p207_p7 = pnand %p206_p6, %p200_p3 }
  0x10   :  { %210 = shalt.err (!%p207_p7)
}
  0x11   :  { %s262_s21 = smov 128   ;;  %s263_s22 = smov 8  }
  0x12   :  { %29 = dma.hbm_to_vmem [thread:$0]  %s332_s1, 1024, %s24_s13, [#allocation5], %s262_s21, %s262_s21, %s263_s22  }
  0x13   :  { %s264_s25 = smov [#allocation7]   ;;  %s211_s29 = scalar_lea.hbm %s333_s2, 1024 }
  0x14   :  { %s41_s26 = sshll.u32 %s264_s25, 4  ;;  %p212_p8 = scmp.ne.s32.totalorder %s333_s2, %s211_s29  ;;  %s42_s26 = int_to_ptr.vmem [resolvable:$true] %s41_s26 }
  0x15   :  { %p215_p9 = scmp.lt.u32.totalorder %s211_s29, %s333_s2 }
  0x17   :  { %p217_p10 = pnand %p215_p9, %p212_p8 }
  0x19   :  { %220 = shalt.err (!%p217_p10)
}
  0x1a   :  { %s221_s7 = scalar_lea.vmem %s42_s26, 1024  ;;  %p226_p12 = scmp.lt.s32.totalorder %s42_s26, %s42_s26 }
  0x1b   :  { %p222_p11 = scmp.ne.s32.totalorder %s42_s26, %s221_s7  ;;  %p227_p13 = scmp.lt.s32.totalorder %s221_s7, %s221_s7 }
  0x1d   :  { %p228_p0 = por %p227_p13, %p226_p12 }
  0x1f   :  { %p229_p1 = pnand %p228_p0, %p222_p11 }
  0x21   :  { %232 = shalt.err (!%p229_p1)
}
  0x22   :  { %47 = dma.hbm_to_vmem [thread:$0]  %s333_s2, 1024, %s42_s26, [#allocation8], %s262_s21, %s262_s21, %s263_s22  }
  0x23   :  { %255 = dma.done.wait [#allocation5], 1024  }
  0x24   :  { %256 = vsyncadd [#allocation5], 4294966272 }
  0x25   :  { %257 = dma.done.wait [#allocation8], 1024  }
  0x26   :  { %258 = vsyncadd [#allocation8], 4294966272  ;;  %v70_v0 = vld [vmem:[#allocation4] sm:$0xff]  ;;  %v71_v1 = vld [vmem:[#allocation4 + $0x8] sm:$0xff]  ;;  %s265_s2 = smov [#allocation9]  }
  0x27   :  { %v72_v2 = vld [vmem:[#allocation4 + $0x10] sm:$0xff]  ;;  %v73_v3 = vld [vmem:[#allocation4 + $0x18] sm:$0xff]  ;;  %v87_v4 = vadd.f32 %v71_v1, %v70_v0  ;;  %v78_v5 = vld [vmem:[#allocation7] sm:$0xff]  ;;  %v109_v6 = vmul.f32 %v70_v0, %v70_v0  ;;  %v110_v7 = vmul.f32 %v71_v1, %v71_v1  ;;  %s166_s9 = sshll.u32 %s265_s2, 4  ;;  %s167_s9 = int_to_ptr.vmem [resolvable:$true] %s166_s9 }
  0x28   :  { %v79_v9 = vld [vmem:[#allocation7 + $0x8] sm:$0xff]  ;;  %v80_v10 = vld [vmem:[#allocation7 + $0x10] sm:$0xff]  ;;  %v81_v11 = vld [vmem:[#allocation7 + $0x18] sm:$0xff]  ;;  %v111_v12 = vmul.f32 %v72_v2, %v72_v2  ;;  %v112_v13 = vmul.f32 %v73_v3, %v73_v3  ;;  %v117_v14 = vmul.f32 %v78_v5, %v78_v5  ;;  %v144_v40 = vmul.f32 %v78_v5, %v70_v0  ;;  %s233_s10 = scalar_lea.vmem %s167_s9, 512  ;;  %p238_p3 = scmp.lt.s32.totalorder %s167_s9, %s167_s9 }
  0x29   :  { %v88_v8 = vadd.f32 %v87_v4, %v72_v2  ;;  %v74_v15 = vld [vmem:[#allocation4 + $0x20] sm:$0xff]  ;;  %v98_v17 = vadd.f32 %v79_v9, %v78_v5  ;;  %v118_v18 = vmul.f32 %v79_v9, %v79_v9  ;;  %v119_v19 = vmul.f32 %v80_v10, %v80_v10  ;;  %v75_v21 = vld [vmem:[#allocation4 + $0x28] sm:$0xff]  ;;  %v76_v27 = vld [vmem:[#allocation4 + $0x30] sm:$0xff]  ;;  %p234_p2 = scmp.ne.s32.totalorder %s167_s9, %s233_s10  ;;  %p239_p4 = scmp.lt.s32.totalorder %s233_s10, %s233_s10 }
  0x2a   :  { %v82_v16 = vld [vmem:[#allocation7 + $0x20] sm:$0xff]  ;;  %v120_v20 = vmul.f32 %v81_v11, %v81_v11  ;;  %v83_v23 = vld [vmem:[#allocation7 + $0x28] sm:$0xff]  ;;  %v125_v25 = vadd.f32 %v117_v14, %v109_v6  ;;  %v113_v29 = vmul.f32 %v74_v15, %v74_v15  ;;  %v84_v32 = vld [vmem:[#allocation7 + $0x30] sm:$0xff]  ;;  %v114_v34 = vmul.f32 %v75_v21, %v75_v21 }
  0x2b   :  { %v89_v22 = vadd.f32 %v88_v8, %v73_v3  ;;  %v99_v24 = vadd.f32 %v98_v17, %v80_v10  ;;  %v126_v26 = vadd.f32 %v118_v18, %v110_v7  ;;  %v121_v30 = vmul.f32 %v82_v16, %v82_v16  ;;  %v77_v37 = vld [vmem:[#allocation4 + $0x38] sm:$0xff]  ;;  %p240_p5 = por %p239_p4, %p238_p3 }
  0x2c   :  { %v127_v31 = vadd.f32 %v119_v19, %v111_v12  ;;  %v122_v35 = vmul.f32 %v83_v23, %v83_v23  ;;  %v128_v36 = vadd.f32 %v120_v20, %v112_v13  ;;  %v145_v41 = vmul.f32 %v79_v9, %v71_v1  ;;  %v85_v42 = vld [vmem:[#allocation7 + $0x38] sm:$0xff] }
  0x2d   :  { %v90_v28 = vadd.f32 %v89_v22, %v74_v15  ;;  %v100_v33 = vadd.f32 %v99_v24, %v81_v11  ;;  %v133_v39 = vadd.f32 %v126_v26, %v125_v25  ;;  %v115_v44 = vmul.f32 %v76_v27, %v76_v27  ;;  %p241_p6 = pnand %p240_p5, %p234_p2 }
  0x2e   :  { %v146_v45 = vmul.f32 %v80_v10, %v72_v2  ;;  %v123_v47 = vmul.f32 %v84_v32, %v84_v32  ;;  %v129_v48 = vadd.f32 %v121_v30, %v113_v29  ;;  %v116_v51 = vmul.f32 %v77_v37, %v77_v37 }
  0x2f   :  { %v91_v38 = vadd.f32 %v90_v28, %v75_v21  ;;  %v101_v43 = vadd.f32 %v100_v33, %v82_v16  ;;  %v134_v49 = vadd.f32 %v133_v39, %v127_v31  ;;  %v147_v52 = vmul.f32 %v81_v11, %v73_v3 }
  0x30   :  { %v152_v53 = vadd.f32 %v145_v41, %v144_v40  ;;  %v124_v55 = vmul.f32 %v85_v42, %v85_v42  ;;  %v130_v56 = vadd.f32 %v122_v35, %v114_v34  ;;  %v148_v59 = vmul.f32 %v82_v16, %v74_v15 }
  0x31   :  { %v92_v46 = vadd.f32 %v91_v38, %v76_v27  ;;  %v102_v50 = vadd.f32 %v101_v43, %v83_v23  ;;  %v135_v57 = vadd.f32 %v134_v49, %v128_v36  ;;  %v131_v61 = vadd.f32 %v123_v47, %v115_v44 }
  0x32   :  { %v153_v60 = vadd.f32 %v152_v53, %v146_v45  ;;  %v149_v0 = vmul.f32 %v83_v23, %v75_v21  ;;  %v132_v2 = vadd.f32 %v124_v55, %v116_v51  ;;  %v150_v5 = vmul.f32 %v84_v32, %v76_v27 }
  0x33   :  { %v93_v54 = vadd.f32 %v92_v46, %v77_v37  ;;  %v103_v58 = vadd.f32 %v102_v50, %v84_v32  ;;  %v136_v62 = vadd.f32 %v135_v57, %v129_v48  ;;  %v151_v3 = vmul.f32 %v85_v42, %v77_v37 }
  0x34   :  { %v154_v1 = vadd.f32 %v153_v60, %v147_v52 }
  0x35   :  { %v104_v63 = vadd.f32 %v103_v58, %v85_v42  ;;  %95 = vst [vmem:[#allocation9] sm:$0xff] %v93_v54  ;;  %v137_v4 = vadd.f32 %v136_v62, %v130_v56 }
  0x36   :  { %v155_v6 = vadd.f32 %v154_v1, %v148_v59 }
  0x37   :  { %v138_v7 = vadd.f32 %v137_v4, %v131_v61  ;;  %106 = vst [vmem:[#allocation9 + $0x8] sm:$0xff] %v104_v63 }
  0x38   :  { %v156_v8 = vadd.f32 %v155_v6, %v149_v0 }
  0x39   :  { %v139_v9 = vadd.f32 %v138_v7, %v132_v2 }
  0x3a   :  { %v157_v10 = vadd.f32 %v156_v8, %v150_v5 }
  0x3b   :  { %141 = vst [vmem:[#allocation9 + $0x10] sm:$0xff] %v139_v9 }
  0x3c   :  { %v158_v11 = vadd.f32 %v157_v10, %v151_v3 }
  0x3e   :  { %160 = vst [vmem:[#allocation9 + $0x18] sm:$0xff] %v158_v11 }
  0x3f   :  { %244 = shalt.err (!%p241_p6)
}
  0x40   :  { %s245_s13 = scalar_lea.hbm %s334_s3, 512 }
  0x41   :  { %p246_p7 = scmp.ne.s32.totalorder %s334_s3, %s245_s13  ;;  %p249_p8 = scmp.lt.u32.totalorder %s245_s13, %s334_s3 }
  0x43   :  { %p251_p9 = pnand %p249_p8, %p246_p7 }
  0x45   :  { %254 = shalt.err (!%p251_p9)
}
  0x46   :  { %172 = dma.vmem_to_hbm [thread:$0]  %s167_s9, 512, %s334_s3, [#allocation6], %s262_s21, %s262_s21, %s263_s22  }
  0x47   :  { %259 = dma.done.wait [#allocation6], 512  }
  0x48   :  { %260 = vsyncadd [#allocation6], 4294966784 }
  0x49   :  { %176 = vsyncpa [#allocation5], 1 }
  0x4a   :  { %177 = vsyncpa [#allocation8], 1 }
  0x4b   :  { %178 = vsyncpa [#allocation6], 1 }

</bundles_post_ra>
